<compile_context>
chip_gen: v6e
topology: v6e:2x2x1
jax: 0.10.0
libtpu: 0.0.40
codegen_flags: <defaults>
</compile_context>

<pallas_src>
import functools

import jax
import jax.numpy as jnp
from jax.experimental import pallas as pl
from jax.experimental.pallas import tpu as pltpu


def _finalize(y, inp_ref, b_ref, gamma_ref, beta_ref, o_ref, *, eps, inv_hidden, pre_norm):
    # bias + residual add (f32 math)
    y = y + b_ref[...].astype(jnp.float32) + inp_ref[...].astype(jnp.float32)

    # dropout: identity in eval/inference mode
    # TODO(synk): training-mode dropout (stochastic mask via pltpu.prng_random_bits) not emitted.

    if pre_norm:
        o_ref[...] = y.astype(o_ref.dtype)
        return

    # LayerNorm over the *real* hidden size. Padded lanes of y are exactly zero
    # (padded W columns, bias, residual are zero), so dividing the raw sums by the
    # real H recovers the unpadded mean / E[y^2]. Single pass: two XLU reductions.
    mean = jnp.sum(y, axis=-1, keepdims=True) * inv_hidden
    meansq = jnp.sum(y * y, axis=-1, keepdims=True) * inv_hidden
    var = jnp.maximum(meansq - mean * mean, 0.0)
    inv_std = jax.lax.rsqrt(var + eps)
    out = (y - mean) * inv_std * gamma_ref[...].astype(jnp.float32) \
          + beta_ref[...].astype(jnp.float32)
    o_ref[...] = out.astype(o_ref.dtype)


def _bert_output_kernel(x_ref, inp_ref, w_ref, b_ref, gamma_ref, beta_ref, o_ref,
                        *scratch, eps, inv_hidden, pre_norm, single_k):
    if single_k:
        # K fully resident: straight-line matmul + finalize.
        y = jnp.dot(x_ref[...], w_ref[...], preferred_element_type=jnp.float32)
        _finalize(y, inp_ref, b_ref, gamma_ref, beta_ref, o_ref,
                  eps=eps, inv_hidden=inv_hidden, pre_norm=pre_norm)
    else:
        # K tiled: accumulate in f32 VMEM scratch, finalize on the last K step.
        acc_ref, = scratch
        k = pl.program_id(1)

        @pl.when(k == 0)
        def _():
            acc_ref[...] = jnp.zeros_like(acc_ref)

        acc_ref[...] += jnp.dot(x_ref[...], w_ref[...], preferred_element_type=jnp.float32)

        @pl.when(k == pl.num_programs(1) - 1)
        def _():
            _finalize(acc_ref[...], inp_ref, b_ref, gamma_ref, beta_ref, o_ref,
                      eps=eps, inv_hidden=inv_hidden, pre_norm=pre_norm)


def bert_output(hidden_states, input_tensor, weight, bias, gamma=None, beta=None,
                eps=1e-12, *, pre_norm=False, tm=None, compute_dtype=None):
    """hidden_states: (B, S, K_intermediate); input_tensor: (B, S, H_hidden);
    weight: (K, H) (= torch nn.Linear weight transposed once); bias/gamma/beta: (H,)."""
    B, S, K = hidden_states.shape
    _, _, H = input_tensor.shape
    rows = B * S
    out_dtype = hidden_states.dtype

    # bf16 MXU inputs by default (f32 accumulation + f32 LN math stay): critical on v5e,
    # and halves x/weight HBM bytes on the bandwidth-bound v6e path.
    if compute_dtype is None:
        compute_dtype = jnp.bfloat16 if hidden_states.dtype == jnp.float32 else hidden_states.dtype

    cbytes = jnp.dtype(compute_dtype).itemsize
    ibytes = jnp.dtype(input_tensor.dtype).itemsize
    obytes = jnp.dtype(out_dtype).itemsize

    # dtype-dependent sublane multiple (8 f32 / 16 bf16 / 32 int8)
    sub = {4: 8, 2: 16, 1: 32}.get(cbytes, 8)

    # ---- chip-aware VMEM budget ----
    try:
        vmem_cap = int(pltpu.get_tpu_info().vmem_capacity_bytes)
    except Exception:
        vmem_cap = 64 * 1024 * 1024  # conservative (v7x per-TC) fallback
    budget = int(vmem_cap * 0.85)

    # ---- row tiling ----
    if tm is None:
        tm = 512 if cbytes <= 2 else 256
    rows_aligned = pl.cdiv(rows, sub) * sub
    tm_eff = min(tm, rows_aligned)
    tm_eff = pl.cdiv(tm_eff, sub) * sub
    rows_pad = pl.cdiv(rows, tm_eff) * tm_eff
    # give both TensorCores work when possible (grid >= 2 under "parallel")
    if rows_pad // tm_eff < 2 and rows_aligned >= 2 * sub:
        tm_eff = pl.cdiv(pl.cdiv(rows_aligned, 2), sub) * sub
        rows_pad = pl.cdiv(rows, tm_eff) * tm_eff

    # ---- lane padding ----
    H_pad = pl.cdiv(H, 128) * 128
    K_pad0 = pl.cdiv(K, 128) * 128

    def est_vmem(tk_e, nk_e):
        wbuf = 1 if nk_e == 1 else 2           # single-buffer resident weight
        return (2 * tm_eff * tk_e * cbytes      # x tiles (double-buffered)
                + 2 * tm_eff * H_pad * ibytes   # residual tiles
                + 2 * tm_eff * H_pad * obytes   # output tiles
                + (tm_eff * H_pad * 4 if nk_e > 1 else 0)   # acc scratch
                + 2 * tm_eff * H_pad * 4        # f32 intermediates headroom
                + wbuf * tk_e * H_pad * cbytes  # weight
                + 3 * H_pad * 4)                # bias/gamma/beta (single-buffered)

    # ---- optional K tiling (only when resident weight + x tile would blow VMEM) ----
    if est_vmem(K_pad0, 1) <= budget:
        tk, K_pad, nk = K_pad0, K_pad0, 1
    else:
        tk = 128
        for cand in (4096, 2048, 1024, 512, 256):
            if cand < K_pad0 and est_vmem(cand, 2) <= budget:
                tk = cand
                break
        K_pad = pl.cdiv(K, tk) * tk
        nk = K_pad // tk
    single_k = (nk == 1)

    # ---- operand prep (casts/pads are conditional; residual & output stay in caller dtype) ----
    x2d = hidden_states.reshape(rows, K)
    if x2d.dtype != compute_dtype:
        x2d = x2d.astype(compute_dtype)
    inp2d = input_tensor.reshape(rows, H)
    w = weight if weight.dtype == compute_dtype else weight.astype(compute_dtype)
    b = bias.astype(jnp.float32).reshape(1, H)
    if gamma is None:
        gamma = jnp.ones((H,), jnp.float32)
    if beta is None:
        beta = jnp.zeros((H,), jnp.float32)
    g = gamma.astype(jnp.float32).reshape(1, H)
    be = beta.astype(jnp.float32).reshape(1, H)

    if rows_pad != rows or K_pad != K:
        x2d = jnp.pad(x2d, ((0, rows_pad - rows), (0, K_pad - K)))
    if rows_pad != rows or H_pad != H:
        inp2d = jnp.pad(inp2d, ((0, rows_pad - rows), (0, H_pad - H)))
    if K_pad != K or H_pad != H:
        w = jnp.pad(w, ((0, K_pad - K), (0, H_pad - H)))
    if H_pad != H:
        b = jnp.pad(b, ((0, 0), (0, H_pad - H)))
        g = jnp.pad(g, ((0, 0), (0, H_pad - H)))
        be = jnp.pad(be, ((0, 0), (0, H_pad - H)))

    grid = (rows_pad // tm_eff, nk)

    est = est_vmem(tk, nk)
    vmem_limit = int(min(budget, max(2 * est, 32 * 1024 * 1024)))

    cost = pl.CostEstimate(
        flops=2 * rows_pad * K_pad * H_pad,
        transcendentals=0 if pre_norm else rows_pad,   # one rsqrt per row
        bytes_accessed=(rows_pad * K_pad * cbytes
                        + rows_pad * H_pad * ibytes
                        + rows_pad * H_pad * obytes
                        + K_pad * H_pad * cbytes
                        + 3 * H_pad * 4),
    )

    # resident operands (constant index maps) -> single buffer; streamed operands keep
    # the default double-buffering (extra depth would only eat VMEM on an HBM-bound kernel).
    resident = pl.Buffered(1)
    w_spec = (pl.BlockSpec((K_pad, H_pad), lambda i, k: (0, 0), pipeline_mode=resident)
              if single_k else
              pl.BlockSpec((tk, H_pad), lambda i, k: (k, 0)))

    in_specs = [
        pl.BlockSpec((tm_eff, tk), lambda i, k: (i, k)),                         # x rows
        pl.BlockSpec((tm_eff, H_pad), lambda i, k: (i, 0)),                      # residual rows
        w_spec,                                                                  # weight
        pl.BlockSpec((1, H_pad), lambda i, k: (0, 0), pipeline_mode=resident),   # bias
        pl.BlockSpec((1, H_pad), lambda i, k: (0, 0), pipeline_mode=resident),   # gamma
        pl.BlockSpec((1, H_pad), lambda i, k: (0, 0), pipeline_mode=resident),   # beta
    ]
    scratch_shapes = [] if single_k else [pltpu.VMEM((tm_eff, H_pad), jnp.float32)]

    kernel = functools.partial(
        _bert_output_kernel,
        eps=float(eps),
        inv_hidden=1.0 / float(H),
        pre_norm=bool(pre_norm),
        single_k=single_k,
    )

    out = pl.pallas_call(
        kernel,
        out_shape=jax.ShapeDtypeStruct((rows_pad, H_pad), out_dtype),
        grid_spec=pltpu.PrefetchScalarGridSpec(
            num_scalar_prefetch=0,
            grid=grid,
            in_specs=in_specs,
            out_specs=pl.BlockSpec((tm_eff, H_pad), lambda i, k: (i, 0)),
            scratch_shapes=scratch_shapes,
        ),
        compiler_params=pltpu.CompilerParams(
            dimension_semantics=("parallel", "arbitrary"),
            vmem_limit_bytes=vmem_limit,
        ),
        cost_estimate=cost,
    )(x2d, inp2d, w, b, g, be)

    return out[:rows, :H].reshape(B, S, H)


def reference(hidden_states, input_tensor, weight, bias, gamma, beta, eps, pre_norm=False):
    y = jnp.einsum("bsk,kh->bsh", hidden_states.astype(jnp.float32),
                   weight.astype(jnp.float32)) + bias
    y = y + input_tensor.astype(jnp.float32)
    if pre_norm:
        return y
    mean = jnp.mean(y, axis=-1, keepdims=True)
    var = jnp.mean((y - mean) ** 2, axis=-1, keepdims=True)
    return (y - mean) * jax.lax.rsqrt(var + eps) * gamma + beta


if __name__ == "__main__":
    # Small BERT-like config: batch=2, seq=8, intermediate=64, hidden=32, post-norm, eval mode.
    B, S = 2, 8
    K = 64     # config.intermediate_size
    H = 32     # config.hidden_size
    eps = 1e-12

    key = jax.random.PRNGKey(0)
    k_x, k_in, k_w, k_b, k_g, k_be = jax.random.split(key, 6)

    hidden_states = jax.random.normal(k_x, (B, S, K), dtype=jnp.float32)
    input_tensor = jax.random.normal(k_in, (B, S, H), dtype=jnp.float32)

    # nn.Linear(K, H): torch weight is (out, in) = (H, K) -> store transposed as (K, H).
    w_torch_layout = jax.random.normal(k_w, (H, K), dtype=jnp.float32) * 0.02
    weight = w_torch_layout.T
    bias = jax.random.normal(k_b, (H,), dtype=jnp.float32) * 0.02
    gamma = 1.0 + 0.01 * jax.random.normal(k_g, (H,), dtype=jnp.float32)
    beta = 0.01 * jax.random.normal(k_be, (H,), dtype=jnp.float32)

    ref = reference(hidden_states, input_tensor, weight, bias, gamma, beta, eps)

    # Exact-semantics check: force f32 MXU inputs (matches PyTorch eval-mode module closely).
    out_f32 = jax.block_until_ready(
        bert_output(hidden_states, input_tensor, weight, bias, gamma, beta, eps,
                    compute_dtype=jnp.float32))
    assert out_f32.shape == (B, S, H)
    assert jnp.allclose(out_f32, ref, atol=1e-4, rtol=1e-4), "f32 mismatch vs reference"

    # Default (perf) path: bf16 MXU inputs with f32 accumulation / f32 LayerNorm.
    out_def = jax.block_until_ready(
        bert_output(hidden_states, input_tensor, weight, bias, gamma, beta, eps))
    assert jnp.allclose(out_def, ref, atol=5e-2, rtol=5e-2), "bf16 mismatch vs reference"

    # pre_norm=True branch of the module: residual add only, no LayerNorm.
    ref_pre = reference(hidden_states, input_tensor, weight, bias, gamma, beta, eps,
                        pre_norm=True)
    out_pre = jax.block_until_ready(
        bert_output(hidden_states, input_tensor, weight, bias, gamma, beta, eps,
                    pre_norm=True, compute_dtype=jnp.float32))
    assert jnp.allclose(out_pre, ref_pre, atol=1e-4, rtol=1e-4), "pre_norm mismatch vs reference"

    print("KERNEL_OK")
</pallas_src>

<mosaic_0001>
module attributes {stable_mosaic.version = 11 : i64} {
  func.func @_bert_output_kernel(%arg0: i32, %arg1: i32, %arg2: memref<8x128xf32, #tpu.memory_space<vmem>>, %arg3: memref<8x128xf32, #tpu.memory_space<vmem>>, %arg4: memref<128x128xf32, #tpu.memory_space<vmem>>, %arg5: memref<1x128xf32, #tpu.memory_space<vmem>>, %arg6: memref<1x128xf32, #tpu.memory_space<vmem>>, %arg7: memref<1x128xf32, #tpu.memory_space<vmem>>, %arg8: memref<8x128xf32, #tpu.memory_space<vmem>>) attributes {dimension_semantics = [#tpu.dimension_semantics<parallel>, #tpu.dimension_semantics<arbitrary>], iteration_bounds = array<i64: 2, 1>, scalar_prefetch = 0 : i64, scratch_operands = 0 : i64, tpu.core_type = #tpu.core_type<tc>, window_params = [{transform_indices = @transform_0, window_bounds = array<i64: 8, 128>}, {transform_indices = @transform_1, window_bounds = array<i64: 8, 128>}, {pipeline_mode = #tpu.pipeline_mode<synchronous>, transform_indices = @transform_2, window_bounds = array<i64: 128, 128>}, {pipeline_mode = #tpu.pipeline_mode<synchronous>, transform_indices = @transform_3, window_bounds = array<i64: 1, 128>}, {pipeline_mode = #tpu.pipeline_mode<synchronous>, transform_indices = @transform_4, window_bounds = array<i64: 1, 128>}, {pipeline_mode = #tpu.pipeline_mode<synchronous>, transform_indices = @transform_5, window_bounds = array<i64: 1, 128>}, {transform_indices = @transform_6, window_bounds = array<i64: 8, 128>}]} {
    %c0 = arith.constant 0 : index
    %c0_0 = arith.constant 0 : index
    %0 = vector.load %arg2[%c0, %c0_0] : memref<8x128xf32, #tpu.memory_space<vmem>>, vector<8x128xf32>
    %c0_1 = arith.constant 0 : index
    %c0_2 = arith.constant 0 : index
    %1 = vector.load %arg4[%c0_1, %c0_2] : memref<128x128xf32, #tpu.memory_space<vmem>>, vector<128x128xf32>
    %cst = arith.constant dense<0.000000e+00> : vector<8x128xf32>
    %2 = tpu.matmul %0, %1, %cst {dimension_numbers = #tpu.dot_dimension_numbers<[1], [0], [0], [1], [0, 0, 1, 1], [], []>} : vector<8x128xf32>, vector<128x128xf32>, vector<8x128xf32> -> vector<8x128xf32>
    %c0_3 = arith.constant 0 : index
    %c0_4 = arith.constant 0 : index
    %3 = vector.load %arg5[%c0_3, %c0_4] : memref<1x128xf32, #tpu.memory_space<vmem>>, vector<1x128xf32>
    %4 = vector.broadcast %3 : vector<1x128xf32> to vector<8x128xf32>
    %5 = arith.addf %2, %4 : vector<8x128xf32>
    %c0_5 = arith.constant 0 : index
    %c0_6 = arith.constant 0 : index
    %6 = vector.load %arg3[%c0_5, %c0_6] : memref<8x128xf32, #tpu.memory_space<vmem>>, vector<8x128xf32>
    %7 = arith.addf %5, %6 : vector<8x128xf32>
    %cst_7 = arith.constant dense<0.000000e+00> : vector<8xf32>
    %8 = vector.multi_reduction <add>, %7, %cst_7 [1] : vector<8x128xf32> to vector<8xf32>
    %9 = vector.shape_cast %8 : vector<8xf32> to vector<8x1xf32>
    %cst_8 = arith.constant 3.125000e-02 : f32
    %10 = vector.broadcast %cst_8 : f32 to vector<8x1xf32>
    %11 = arith.mulf %9, %10 : vector<8x1xf32>
    %12 = arith.mulf %7, %7 : vector<8x128xf32>
    %cst_9 = arith.constant dense<0.000000e+00> : vector<8xf32>
    %13 = vector.multi_reduction <add>, %12, %cst_9 [1] : vector<8x128xf32> to vector<8xf32>
    %14 = vector.shape_cast %13 : vector<8xf32> to vector<8x1xf32>
    %cst_10 = arith.constant 3.125000e-02 : f32
    %15 = vector.broadcast %cst_10 : f32 to vector<8x1xf32>
    %16 = arith.mulf %14, %15 : vector<8x1xf32>
    %17 = arith.mulf %11, %11 : vector<8x1xf32>
    %18 = arith.subf %16, %17 : vector<8x1xf32>
    %cst_11 = arith.constant 0.000000e+00 : f32
    %19 = vector.broadcast %cst_11 : f32 to vector<8x1xf32>
    %20 = arith.maximumf %18, %19 : vector<8x1xf32>
    %cst_12 = arith.constant 9.99999996E-13 : f32
    %21 = vector.broadcast %cst_12 : f32 to vector<8x1xf32>
    %22 = arith.addf %20, %21 : vector<8x1xf32>
    %23 = math.rsqrt %22 : vector<8x1xf32>
    %24 = vector.broadcast %11 : vector<8x1xf32> to vector<8x128xf32>
    %25 = arith.subf %7, %24 : vector<8x128xf32>
    %26 = vector.broadcast %23 : vector<8x1xf32> to vector<8x128xf32>
    %27 = arith.mulf %25, %26 : vector<8x128xf32>
    %c0_13 = arith.constant 0 : index
    %c0_14 = arith.constant 0 : index
    %28 = vector.load %arg6[%c0_13, %c0_14] : memref<1x128xf32, #tpu.memory_space<vmem>>, vector<1x128xf32>
    %29 = vector.broadcast %28 : vector<1x128xf32> to vector<8x128xf32>
    %30 = arith.mulf %27, %29 : vector<8x128xf32>
    %c0_15 = arith.constant 0 : index
    %c0_16 = arith.constant 0 : index
    %31 = vector.load %arg7[%c0_15, %c0_16] : memref<1x128xf32, #tpu.memory_space<vmem>>, vector<1x128xf32>
    %32 = vector.broadcast %31 : vector<1x128xf32> to vector<8x128xf32>
    %33 = arith.addf %30, %32 : vector<8x128xf32>
    %c0_17 = arith.constant 0 : index
    %c0_18 = arith.constant 0 : index
    %34 = vector.load %arg8[%c0_17, %c0_18] : memref<8x128xf32, #tpu.memory_space<vmem>>, vector<8x128xf32>
    tpu.vector_store %arg8[%c0_17, %c0_18], %33 {strides = array<i32>} : memref<8x128xf32, #tpu.memory_space<vmem>>, vector<8x128xf32>,
    return
  }
  func.func @transform_0(%arg0: i32, %arg1: i32) -> (i32, i32) {
    %c0_i32 = arith.constant 0 : i32
    return %arg0, %arg1 : i32, i32
  }
  func.func @transform_1(%arg0: i32, %arg1: i32) -> (i32, i32) {
    %c0_i32 = arith.constant 0 : i32
    %c0_i32_0 = arith.constant 0 : i32
    return %arg0, %c0_i32 : i32, i32
  }
  func.func @transform_2(%arg0: i32, %arg1: i32) -> (i32, i32) {
    %c0_i32 = arith.constant 0 : i32
    %c0_i32_0 = arith.constant 0 : i32
    %c0_i32_1 = arith.constant 0 : i32
    return %c0_i32, %c0_i32_0 : i32, i32
  }
  func.func @transform_3(%arg0: i32, %arg1: i32) -> (i32, i32) {
    %c0_i32 = arith.constant 0 : i32
    %c0_i32_0 = arith.constant 0 : i32
    %c0_i32_1 = arith.constant 0 : i32
    return %c0_i32, %c0_i32_0 : i32, i32
  }
  func.func @transform_4(%arg0: i32, %arg1: i32) -> (i32, i32) {
    %c0_i32 = arith.constant 0 : i32
    %c0_i32_0 = arith.constant 0 : i32
    %c0_i32_1 = arith.constant 0 : i32
    return %c0_i32, %c0_i32_0 : i32, i32
  }
  func.func @transform_5(%arg0: i32, %arg1: i32) -> (i32, i32) {
    %c0_i32 = arith.constant 0 : i32
    %c0_i32_0 = arith.constant 0 : i32
    %c0_i32_1 = arith.constant 0 : i32
    return %c0_i32, %c0_i32_0 : i32, i32
  }
  func.func @transform_6(%arg0: i32, %arg1: i32) -> (i32, i32) {
    %c0_i32 = arith.constant 0 : i32
    %c0_i32_0 = arith.constant 0 : i32
    return %arg0, %c0_i32 : i32, i32
  }
}

</mosaic_0001>

<bundles_post_ra>
// kernel: tpu_custom_call.1
= control target key start
LH: loop header
LB: loop body
LE: loop exit
PB: predicated region body
PF: predicated region fallthrough
CT: control target
= control target key end

     0   :  { %s1155_s0 = inlined_call_operand.hbm [shape: f32[16,128], index: 0, kind: input, shape index: {}]   ;;  %s1156_s1 = inlined_call_operand.hbm [shape: f32[16,128], index: 1, kind: input, shape index: {}]   ;;  %s1157_s2 = inlined_call_operand.hbm [shape: f32[128,128], index: 2, kind: input, shape index: {}]   ;;  %s1158_s3 = inlined_call_operand.vmem [shape: f32[1,128], index: 3, kind: input, shape index: {}]   ;;  %s1159_s4 = inlined_call_operand.vmem [shape: f32[1,128], index: 4, kind: input, shape index: {}]   ;;  %s1160_s5 = inlined_call_operand.vmem [shape: f32[1,128], index: 5, kind: input, shape index: {}]   ;;  %s1161_s6 = inlined_call_operand.hbm [shape: f32[16,128], index: 6, kind: output, shape index: {}]  }
   0x1   :  { %1165 = sst [smem:[#allocation16_spill]] %s1157_s2 }
   0x2   :  { %11 = vsyncpa [#allocation3], 0 }
   0x3   :  { %13 = vsyncpa [#allocation3 + $0x1], 0 }
   0x4   :  { %14 = vsyncpa [#allocation6], 0 }
   0x5   :  { %16 = vsyncpa [#allocation6 + $0x1], 0 }
   0x6   :  { %17 = vsyncpa [#allocation4], 0 }
   0x7   :  { %19 = vsyncpa [#allocation4 + $0x1], 0  ;;  %s954_s21 = smov 0   ;;  %s956_s22 = smov 0  }
   0x8   :  { %s958_s23 = smov 0   ;;  %s960_s24 = smov 0  }
   0x9   :  { %s962_s25 = smov 0   ;;  %s964_s26 = smov 0  }
   0xa LB: > { %1166 = sst [smem:[#allocation13_spill]] %s905_s25  ;;  %s985_s27 = sadd.s32 4294967295, %s909_s26   ;;  %s909_s26 = sphi %s964_s26, %s25_s26   ;;  %s905_s25 = sphi %s962_s25, %s1182_s25   ;;  %s901_s24 = sphi %s960_s24, %s1181_s24   ;;  %s897_s23 = sphi %s958_s23, %s1185_s23   ;;  %s893_s22 = sphi %s956_s22, %s1184_s22   ;;  %s889_s21 = sphi %s954_s21, %s1183_s21  }
   0xb   : > { %s583_s28 = sadd.s32 4294967294, %s909_s26   ;;  %p59_p0 = scmp.ne.s32.totalorder %s893_s22, %s889_s21 }
   0xc   : > { %p60_p1 = scmp.eq.s32.totalorder %s985_s27, 0  ;;  %p199_p3 = scmp.eq.s32.totalorder %s583_s28, 1 }
   0xd   : > { %p584_p5 = scmp.ge.s32.totalorder %s909_s26, 1  ;;  %p206_p7 = scmp.lt.s32.totalorder %s909_s26, 3 }
   0xe   : > { %p994_p4 = por %p60_p1, %p59_p0  ;;  %p999_p6 = por %p199_p3, %p59_p0 }
   0xf   : > { %p1004_p8 = pnand %p584_p5, %p206_p7  ;;  %s911_s8 = smov [#allocation7]  }
  0x10   : > { %s1168_s30 = scalar_select %p999_p6, 1, 0 }
  0x11   : > { %s218_s9 = sshll.u32 %s911_s8, 4  ;;  %p665_p9 = pneg %p1004_p8  ;;  %s219_s9 = int_to_ptr.vmem [resolvable:$true] %s218_s9 }
  0x12   : > { %1169 = sst [smem:[#allocation14_spill]] %s1168_s30  ;;  %s37_s11 = sadd.s32 1, %s905_s25 }
  0x13   : > { %p1013_p11 = pnand %p665_p9, %p60_p1  ;;  %s750_s12 = scalar_lea.vmem %s219_s9, 2048 }
  0x14   : > { %p751_p13 = scmp.ne.s32.totalorder %s219_s9, %s750_s12  ;;  %p758_p5 = scmp.lt.s32.totalorder %s219_s9, %s219_s9 }
  0x15   : > { %p741_p12 = pneg %p1013_p11  ;;  %p759_p7 = scmp.lt.s32.totalorder %s750_s12, %s750_s12 }
  0x17   : > { %p753_p0 = pnand %p751_p13, %p741_p12  ;;  %p760_p2 = por %p759_p7, %p758_p5 }
  0x19   : > { %p754_p3 = pneg %p753_p0 }
  0x1b   : > { %p761_p6 = pnand %p760_p2, %p754_p3 }
  0x1d   : > { %764 = shalt.err (!%p761_p6)
}
  0x1e   : > { %s912_s13 = smov 128   ;;  %s913_s14 = smov 8  }
  0x1f   : > { %s1172_s2 = sld [smem:[#allocation16_spill]]  ;;  %p39_p2 = scmp.ge.s32.totalorder %s37_s11, 2 }
  0x20   : > { %s46_s17 = sadd.s32 1, %s897_s23  ;;  %p53_p6 = scmp.ne.s32.totalorder %s897_s23, %s893_s22 }
  0x21   : > { %p54_p9 = scmp.eq.s32.totalorder %s909_s26, 0  ;;  %s1187_s11 = smov (%p39_p2, %s37_s11), 0 }
  0x22   : > { %1173 = sst [smem:[#allocation15_spill]] %s1187_s11  ;;  %p1175_p13 = scmp.eq.s32.totalorder %s985_s27, 1 }
  0x23   : > { %p1031_p12 = por %p54_p9, %p53_p6  ;;  %s41_s20 = ssub.s32 %s905_s25, %s1187_s11 }
  0x24   : > { %p1037_p0 = por %p1175_p13, %p53_p6  ;;  %p44_p3 = scmp.eq.s32.totalorder %s41_s20, 0 }
  0x25   : > { %668 = dma.hbm_to_vmem [thread:$0]  (!%p1013_p11), %s1172_s2, 2048, %s219_s9, [#allocation6], %s912_s13, %s912_s13, %s913_s14  }
  0x26   : > { %p681_p11 = scmp.lt.s32.totalorder %s909_s26, 2  ;;  %s241_s28 = sand.u32 1, %s897_s23  }
  0x27   : > { %s587_s8 = sshll.u32 %s241_s28, 3  ;;  %s588_s10 = sshll.u32 %s905_s25, 7 }
  0x28   : > { %s1046_s9 = scalar_select %p44_p3, %s897_s23, %s46_s17  }
  0x29   : > { %s251_s14 = scalar_lea.hbm %s1155_s0, %s588_s10  ;;  %s245_s15 = scalar_lea.vmem [#allocation2], %s587_s8 }
  0x2a   : > { %s253_s16 = sshll.u32 %s245_s15, 4  ;;  %p1054_p5 = pnand %p681_p11, %p1031_p12  ;;  %s254_s16 = int_to_ptr.vmem [resolvable:$true] %s253_s16 }
  0x2b   : > { %s1061_s17 = scalar_lea.hbm %s1156_s1, %s588_s10  ;;  %s260_s20 = sand.u32 1, %s909_s26  }
  0x2c   : > { %s242_s25 = scalar_lea.sflag [#allocation3], %s241_s28  ;;  %p767_p7 = pneg %p1054_p5 }
  0x2d   : > { %s778_s12 = scalar_lea.vmem %s254_s16, 128  ;;  %s914_s18 = smov [#allocation2]  }
  0x2e   : > { %p779_p2 = scmp.ne.s32.totalorder %s254_s16, %s778_s12  ;;  %s783_s13 = sshll.u32 %s914_s18, 4  ;;  %s784_s13 = int_to_ptr.vmem [resolvable:$false] %s783_s13 }
  0x2f   : > { %s785_s15 = scalar_lea.vmem %s784_s13, 256  ;;  %p786_p12 = scmp.lt.s32.totalorder %s254_s16, %s784_s13 }
  0x30   : > { %p781_p6 = pnand %p779_p2, %p767_p7  ;;  %p787_p13 = scmp.lt.s32.totalorder %s785_s15, %s778_s12 }
  0x32   : > { %p782_p9 = pneg %p781_p6  ;;  %p788_p11 = por %p787_p13, %p786_p12 }
  0x34   : > { %p789_p3 = pnand %p788_p11, %p782_p9 }
  0x36   : > { %792 = shalt.err (!%p789_p3)
}
  0x37   : > { %672 = dma.hbm_to_vmem [thread:$0]  (!%p1054_p5), %s251_s14, 128, %s254_s16, %s242_s25  }
  0x38   : > { %s264_s30 = scalar_lea.vmem [#allocation5], %s587_s8  ;;  %s261_s28 = scalar_lea.sflag [#allocation6], %s260_s20 }
  0x39   : > { %s271_s11 = sshll.u32 %s264_s30, 4  ;;  %s915_s18 = smov [#allocation5]   ;;  %s272_s11 = int_to_ptr.vmem [resolvable:$true] %s271_s11 }
  0x3a   : > { %s806_s10 = scalar_lea.vmem %s272_s11, 128  ;;  %s811_s13 = sshll.u32 %s915_s18, 4  ;;  %s812_s13 = int_to_ptr.vmem [resolvable:$false] %s811_s13 }
  0x3b   : > { %p807_p2 = scmp.ne.s32.totalorder %s272_s11, %s806_s10  ;;  %s813_s12 = scalar_lea.vmem %s812_s13, 256 }
  0x3c   : > { %p814_p9 = scmp.lt.s32.totalorder %s272_s11, %s812_s13  ;;  %p815_p12 = scmp.lt.s32.totalorder %s813_s12, %s806_s10 }
  0x3d   : > { %p809_p6 = pnand %p807_p2, %p767_p7 }
  0x3e   : > { %p816_p13 = por %p815_p12, %p814_p9 }
  0x3f   : > { %p810_p10 = pneg %p809_p6 }
  0x41   : > { %p817_p11 = pnand %p816_p13, %p810_p10 }
  0x43   : > { %820 = shalt.err (!%p817_p11)
}
  0x44   : > { %675 = dma.hbm_to_vmem [thread:$0]  (!%p1054_p5), %s1061_s17, 128, %s272_s11, %s261_s28  }
  0x45   : > { %280 = sbr.rel (%p1004_p8) target bundleno = 493 (0x1ed), region = 44  ;;  %s1080_s25 = sand.u32 (!%p1004_p8), 1, %s893_s22  }
  0x46   : > { %s1083_s8 = sshll.u32 (!%p1004_p8), %s1080_s25, 3  ;;  %s283_s14 = scalar_lea.sflag (!%p1004_p8), [#allocation3], %s1080_s25 }
  0x47   : > { %s286_s16 = scalar_lea.vmem (!%p1004_p8), [#allocation2], %s1083_s8 }
  0x4a   : > { %872 = dma.done.wait (%p994_p4), %s283_s14, 128  }
  0x4b   : > { %874 = vsyncadd (%p994_p4), %s283_s14, 4294967168  ;;  %s291_s2 = sand.u32 1, %s985_s27   ;;  %s295_s17 = scalar_lea.vmem [#allocation5], %s1083_s8 }
  0x4c   : > { %s292_s7 = scalar_lea.sflag [#allocation6], %s291_s2 }
  0x4d   : > { %876 = dma.done.wait (%p994_p4), %s292_s7, 128  }
  0x4e   : > { %878 = vsyncadd (%p994_p4), %s292_s7, 4294967168 }
  0x4f   : > { %880 = dma.done.wait (%p60_p1), [#allocation6], 2048  }
  0x50   : > { %882 = vsyncadd (%p60_p1), [#allocation6], 4294965248  ;;  %v916_v0 = vmov 0.0   ;;  %vm917_vm0 = vmmov 0   ;;  %v349_v1 = vld [vmem:[#allocation7 + $0x78] sm:$0xff]  ;;  %v348_v2 = vld [vmem:[#allocation7 + $0x70] sm:$0xff] }
  0x51   : > { %620 = vmatprep.subr.mxu0 %v916_v0  ;;  %652 = vmatprep.mubr.msk.f32.mxu0 %vm917_vm0, %v916_v0  ;;  %v347_v3 = vld [vmem:[#allocation7 + $0x68] sm:$0xff]  ;;  %v346_v4 = vld [vmem:[#allocation7 + $0x60] sm:$0xff]  ;;  %v345_v5 = vld [vmem:[#allocation7 + $0x58] sm:$0xff]  ;;  %s600_s28 = sshll.u32 %s901_s24, 7  ;;  %s332_s10 = scalar_lea.vmem [#allocation8], %s1083_s8 }
  0x52   : > { %621 = vmatpush3.msra.mxu0 %v349_v1  ;;  %v344_v6 = vld [vmem:[#allocation7 + $0x50] sm:$0xff]  ;;  %v343_v7 = vld [vmem:[#allocation7 + $0x48] sm:$0xff]  ;;  %v342_v8 = vld [vmem:[#allocation7 + $0x40] sm:$0xff]  ;;  %s474_s18 = sshll.u32 %s332_s10, 4  ;;  %s472_s14 = scalar_lea.hbm %s1161_s6, %s600_s28  ;;  %s475_s18 = int_to_ptr.vmem [resolvable:$true] %s474_s18 }
  0x53   : > { %622 = vmatprep.subr.mxu0 %v916_v0  ;;  %v341_v9 = vld [vmem:[#allocation7 + $0x38] sm:$0xff]  ;;  %v340_v10 = vld [vmem:[#allocation7 + $0x30] sm:$0xff]  ;;  %v339_v11 = vld [vmem:[#allocation7 + $0x28] sm:$0xff]  ;;  %s821_s2 = scalar_lea.vmem %s475_s18, 128  ;;  %s918_s7 = smov [#allocation8]  }
  0x54   : > { %623 = vmatpush3.msra.mxu0 %v348_v2  ;;  %v338_v12 = vld [vmem:[#allocation7 + $0x20] sm:$0xff]  ;;  %v337_v13 = vld [vmem:[#allocation7 + $0x18] sm:$0xff]  ;;  %v336_v14 = vld [vmem:[#allocation7 + $0x10] sm:$0xff]  ;;  %p822_p1 = scmp.ne.s32.totalorder %s475_s18, %s821_s2 }
  0x55   : > { %624 = vmatprep.subr.mxu0 %v916_v0  ;;  %v335_v15 = vld [vmem:[#allocation7 + $0x8] sm:$0xff]  ;;  %v334_v16 = vld [vmem:[#allocation7] sm:$0xff]  ;;  %v427_v20 = vld [vmem:[%s295_s17] sm:$0xff]  ;;  %s825_s17 = sshll.u32 %s918_s7, 4  ;;  %s826_s17 = int_to_ptr.vmem [resolvable:$false] %s825_s17 }
  0x56   : > { %625 = vmatpush3.msra.mxu0 %v347_v3  ;;  %v333_v17 = vld [vmem:[%s286_s16] sm:$0xff]  ;;  %s461_s16 = scalar_lea.sflag [#allocation4], %s1080_s25  ;;  %p823_p4 = pnand %p822_p1, %p1037_p0 }
  0x57   : > { %626 = vmatprep.subr.mxu0 %v916_v0  ;;  %v596_v18 = vld [vmem:[%s1158_s3] ss:$0 sm:$0xff]  ;;  %s827_s24 = scalar_lea.vmem %s826_s17, 256  ;;  %p828_p10 = scmp.lt.s32.totalorder %s475_s18, %s826_s17 }
  0x58   : > { %627 = vmatpush3.msra.mxu0 %v346_v4  ;;  %v597_v35 = vld [vmem:[%s1159_s4] ss:$0 sm:$0xff]  ;;  %p824_p8 = pneg %p823_p4  ;;  %p829_p5 = scmp.lt.s32.totalorder %s827_s24, %s821_s2 }
  0x59   : > { %628 = vmatprep.subr.mxu0 %v916_v0  ;;  %v598_v37 = vld [vmem:[%s1160_s5] ss:$0 sm:$0xff] }
  0x5a   : > { %629 = vmatpush3.msra.mxu0 %v345_v5  ;;  %p830_p7 = por %p829_p5, %p828_p10 }
  0x5b   : > { %630 = vmatprep.subr.mxu0 %v916_v0 }
  0x5c   : > { %631 = vmatpush3.msra.mxu0 %v344_v6  ;;  %p831_p3 = pnand %p830_p7, %p824_p8 }
  0x5d   : > { %632 = vmatprep.subr.mxu0 %v916_v0 }
  0x5e   : > { %633 = vmatpush3.msra.mxu0 %v343_v7 }
  0x5f   : > { %634 = vmatprep.subr.mxu0 %v916_v0 }
  0x60   : > { %635 = vmatpush3.msra.mxu0 %v342_v8 }
  0x61   : > { %636 = vmatprep.subr.mxu0 %v916_v0 }
  0x62   : > { %637 = vmatpush3.msra.mxu0 %v341_v9 }
  0x63   : > { %638 = vmatprep.subr.mxu0 %v916_v0 }
  0x64   : > { %639 = vmatpush3.msra.mxu0 %v340_v10 }
  0x65   : > { %640 = vmatprep.subr.mxu0 %v916_v0 }
  0x66   : > { %641 = vmatpush3.msra.mxu0 %v339_v11 }
  0x67   : > { %642 = vmatprep.subr.mxu0 %v916_v0 }
  0x68   : > { %643 = vmatpush3.msra.mxu0 %v338_v12 }
  0x69   : > { %644 = vmatprep.subr.mxu0 %v916_v0 }
  0x6a   : > { %645 = vmatpush3.msra.mxu0 %v337_v13 }
  0x6b   : > { %646 = vmatprep.subr.mxu0 %v916_v0 }
  0x6c   : > { %647 = vmatpush3.msra.mxu0 %v336_v14 }
  0x6d   : > { %648 = vmatprep.subr.mxu0 %v916_v0 }
  0x6e   : > { %649 = vmatpush3.msra.mxu0 %v335_v15 }
  0x6f   : > { %650 = vmatprep.subr.mxu0 %v916_v0 }
  0x70   : > { %651 = vmatpush3.msra.mxu0 %v334_v16 }
  0x71   : > { %653 = vmatmul.mubr.f32.vlgmr.msra.gmra.mxu0 %v333_v17 }
 0x131   : > { %v423_v19 = vpop.f32.mrf.mxu0 }
 0x132   : > { %v424_v21 = vadd.f32 %v596_v18, %v423_v19 }
 0x133   : > { %v654_v22 = vpop.f32.mrf.mxu0 }
 0x134   : > { %v428_v23 = vadd.f32 %v427_v20, %v424_v21 }
 0x136   : > { %429 = vadd.xlane.f32.xlu0 %v428_v23  ;;  %v432_v24 = vmul.f32 %v428_v23, %v428_v23 }
 0x13a   : > { %433 = vadd.xlane.f32.xlu0 %v432_v24 }
 0x1bf   : > { %v430_v25 = vpop.xlane.xlu0 %429 }
 0x1c0   : > { %v431_v26 = vmul.f32 0.03125, %v430_v25 }
 0x1c2   : > { %v436_v28 = vmul.f32 %v431_v26, %v431_v26  ;;  %v441_v33 = vsub.f32 %v428_v23, %v431_v26 }
 0x1c3   : > { %v434_v27 = vpop.xlane.xlu0 %433 }
 0x1c4   : > { %v435_v29 = vmul.f32 0.03125, %v434_v27 }
 0x1c6   : > { %v437_v30 = vsub.f32 %v435_v29, %v436_v28 }
 0x1c8   : > { %v438_v31 = vmax.f32 %v437_v30, 0.0 }
 0x1ca   : > { %v439_v32 = vadd.f32 1e-12, %v438_v31 }
 0x1cc   : > { %737 = vrsqrt.f32 %v439_v32 }
 0x1d9   : > { %v738_v34 = vpop.eup %737 }
 0x1da   : > { %v442_v36 = vmul.f32 %v738_v34, %v441_v33 }
 0x1dc   : > { %v450_v38 = vmul.f32 %v597_v35, %v442_v36 }
 0x1de   : > { %v458_v39 = vadd.f32 %v598_v37, %v450_v38 }
 0x1e0   : > { %459 = vst [vmem:[%s332_s10] sm:$0xff] %v458_v39 }
 0x1e1   : > { %834 = shalt.err (!%p831_p3)
}
 0x1e2   : > { %s835_s8 = scalar_lea.hbm %s472_s14, 128  ;;  %s839_s29 = scalar_lea.hbm %s1161_s6, 256 }
 0x1e3   : > { %p836_p2 = scmp.ne.s32.totalorder %s472_s14, %s835_s8  ;;  %p840_p12 = scmp.lt.s32.totalorder %s472_s14, %s1161_s6 }
 0x1e4   : > { %p841_p13 = scmp.lt.s32.totalorder %s839_s29, %s835_s8 }
 0x1e5   : > { %p837_p6 = pnand %p836_p2, %p1037_p0 }
 0x1e6   : > { %p842_p11 = por %p841_p13, %p840_p12 }
 0x1e7   : > { %p838_p9 = pneg %p837_p6 }
 0x1e9   : > { %p843_p1 = pnand %p842_p11, %p838_p9 }
 0x1eb   : > { %846 = shalt.err (!%p843_p1)
}
 0x1ec   : > { %663 = dma.vmem_to_hbm [thread:$0]  (%p1037_p0), %s475_s18, 128, %s472_s14, %s461_s16  }
 0x1ed PF: > { %s1178_s30 = sld [smem:[#allocation14_spill]]  ;;  %s486_s11 = sand.u32 1, %s889_s21  }
 0x1ee   : > { %p1180_p8 = scmp.ge.s32.totalorder %s909_s26, 2  ;;  %s487_s28 = scalar_lea.sflag [#allocation4], %s486_s11 }
 0x1f3   : > { %p1179_p4 = scmp.ne.s32.totalorder %s1178_s30, 0 }
 0x1f5   : > { %p677_p10 = pnand %p1180_p8, %p1179_p4 }
 0x1f7   : > { %p678_p5 = pneg %p677_p10 }
 0x1f9   : > { %884 = dma.done.wait (%p678_p5), %s487_s28, 128  }
 0x1fa   : > { %886 = vsyncadd (%p678_p5), %s487_s28, 4294967168  ;;  %s25_s26 = sadd.s32 1, %s909_s26   ;;  %s1181_s24 = sld [smem:[#allocation13_spill]] }
 0x1fb   : > { %p22_p7 = scmp.ge.s32.totalorder %s25_s26, 4   ;;  %s1182_s25 = sld [smem:[#allocation15_spill]] }
 0x1fc   : > { %s1183_s21 = smov %s893_s22  ;;  %s1184_s22 = smov %s897_s23 }
 0x1fd   : > { %s1185_s23 = smov %s1046_s9  ;;  %24 = sbr.rel (!%p22_p7) target bundleno = 10 (0xa), region = 106 }
 0x202   :  { %492 = vsyncpa [#allocation3], 1 }
 0x203   :  { %494 = vsyncpa [#allocation3 + $0x1], 1 }
 0x204   :  { %495 = vsyncpa [#allocation6], 1 }
 0x205   :  { %497 = vsyncpa [#allocation6 + $0x1], 1 }
 0x206   :  { %498 = vsyncpa [#allocation4], 1 }
 0x207   :  { %500 = vsyncpa [#allocation4 + $0x1], 1 }

</bundles_post_ra>
